<compile_context>
chip_gen: v7x
topology: tpu7x:2x2x1
jax: 0.10.0
libtpu: 0.0.40
codegen_flags: <defaults>
</compile_context>

<pallas_src>
import functools
import math

import jax
import jax.numpy as jnp
from jax.experimental import pallas as pl
from jax.experimental.pallas import tpu as pltpu


def _round_up(a, b):
    return (a + b - 1) // b * b


def _base_residual_kernel(x_ref, w1t_ref, w2t_ref,
                          g1_ref, b1_ref, g2_ref, b2_ref, o_ref):
    f32 = jnp.float32
    width = x_ref.shape[-1]
    inv_w = 1.0 / float(width)

    def layer_norm(v, g, b):
        # One-pass statistics: the two reductions are independent (overlap on the XLU).
        s1 = jnp.sum(v, axis=-1, keepdims=True)
        s2 = jnp.sum(v * v, axis=-1, keepdims=True)
        mean = s1 * inv_w
        var = jnp.maximum(s2 * inv_w - mean * mean, 0.0)
        inv = jax.lax.rsqrt(var + 1e-5)
        return (v - mean) * inv * g + b

    x = x_ref[...].astype(f32)
    g1 = g1_ref[...].astype(f32)
    b1 = b1_ref[...].astype(f32)
    g2 = g2_ref[...].astype(f32)
    b2 = b2_ref[...].astype(f32)

    # --- norm1 + ReLU ---
    h = jnp.maximum(layer_norm(x, g1, b1), 0.0)

    # --- fc1: h @ W1^T (weights pre-transposed in wrapper; f32 accumulate) ---
    w1t = w1t_ref[...]
    h = jnp.dot(h.astype(w1t.dtype), w1t, preferred_element_type=f32)

    # --- norm2 + ReLU ---
    h = jnp.maximum(layer_norm(h, g2, b2), 0.0)

    # --- fc2: h @ W2^T ---
    w2t = w2t_ref[...]
    h = jnp.dot(h.astype(w2t.dtype), w2t, preferred_element_type=f32)

    # --- residual add + ReLU, single fused store ---
    o_ref[...] = jnp.maximum(h + x_ref[...].astype(f32), 0.0).astype(o_ref.dtype)


def base_residual_layer(x, w1, w2, gamma1, beta1, gamma2, beta2,
                        *, token_tile=1024, matmul_dtype=None):
    """x: (..., width). w1/w2 in PyTorch (out, in) convention. Returns x's shape/dtype.

    matmul_dtype: optional dtype (e.g. jnp.bfloat16) for the MXU operands; LayerNorm,
    residual and accumulation stay in f32.  None keeps the weights' dtype (exact f32)."""
    orig_shape = x.shape
    width = orig_shape[-1]
    x2d = x.reshape(-1, width)
    tokens = x2d.shape[0]

    if matmul_dtype is not None:
        w1 = w1.astype(matmul_dtype)
        w2 = w2.astype(matmul_dtype)

    # Pre-transpose once in the wrapper (no in-kernel XLU transpose).
    w1t = w1.T                                        # (in, out)
    w2t = w2.T
    g1 = gamma1.reshape(1, width)
    b1 = beta1.reshape(1, width)
    g2 = gamma2.reshape(1, width)
    b2 = beta2.reshape(1, width)

    dbytes = jnp.dtype(x.dtype).itemsize
    wbytes = jnp.dtype(w1t.dtype).itemsize
    sub = 8 if dbytes >= 4 else (16 if dbytes == 2 else 32)

    # Layout-padded dims (VMEM pads lanes to 128, sublanes to the dtype tile).
    wl = _round_up(width, 128)
    wsub = _round_up(width, 8 if wbytes >= 4 else (16 if wbytes == 2 else 32))

    # --- generation-aware VMEM budget ---
    try:
        vmem_cap = int(pltpu.get_tpu_info().vmem_capacity_bytes)
    except Exception:
        vmem_cap = 64 << 20                           # conservative (v7x per-TC)
    budget = int(vmem_cap * 0.8)

    weight_bytes = 2 * wsub * wl * wbytes             # w1t + w2t, single-buffered resident
    param_bytes = 4 * 8 * wl * 4                      # gamma/beta (sublane-padded)
    fixed = weight_bytes + param_bytes + (1 << 20)    # + misc headroom

    x_buffers = 3 if wl <= 256 else 2                 # deeper pipeline when per-tile work is small
    per_row = (x_buffers * wl * dbytes                # x tile buffers
               + 2 * wl * dbytes                      # out tile buffers (double-buffered)
               + 4 * wl * 4)                          # live f32 temporaries in the kernel
    avail = budget - fixed
    if avail < sub * per_row:
        # TODO(synk): add a width-tiled (K/N-chunked) fallback with an f32 accumulator
        # scratch for widths whose resident weights exceed the VMEM budget.
        raise ValueError(
            f"BaseResidualLayer Pallas kernel: resident weights ({weight_bytes} B) do not "
            f"fit the VMEM budget ({budget} B); width tiling is not implemented.")
    max_rows = avail // per_row

    # --- token tile selection ---
    if tokens <= sub:
        tile = tokens                                  # single full-extent block
    else:
        tile = min(token_tile, tokens, max(sub, (max_rows // sub) * sub))
        # guarantee >=2 grid steps so v7x can shard tiles across its 2 TensorCores
        tile = min(tile, _round_up(pl.cdiv(tokens, 2), sub))
        tile = max(sub, (tile // sub) * sub)

    grid = (pl.cdiv(tokens, tile),)                    # partial last block handled by Pallas

    vmem_limit = int(min(budget, max(32 << 20, fixed + tile * per_row + (4 << 20))))

    cost = pl.CostEstimate(
        flops=4 * tokens * width * width,              # two (T,W)x(W,W) matmuls
        transcendentals=2 * tokens,                    # two rsqrts per row
        bytes_accessed=2 * tokens * width * dbytes + 2 * width * width * wbytes,
    )

    def build_specs(use_pipeline_mode):
        def const_spec(shape):
            idx = lambda i: (0,) * len(shape)
            if use_pipeline_mode:
                return pl.BlockSpec(shape, idx, pipeline_mode=pl.Buffered(1))
            return pl.BlockSpec(shape, idx)

        if use_pipeline_mode and x_buffers != 2:
            x_spec = pl.BlockSpec((tile, width), lambda i: (i, 0),
                                  pipeline_mode=pl.Buffered(x_buffers))
        else:
            x_spec = pl.BlockSpec((tile, width), lambda i: (i, 0))

        in_specs = [
            x_spec,                                    # x: tiled over tokens
            const_spec((width, width)),                # w1t: resident, single buffer
            const_spec((width, width)),                # w2t: resident, single buffer
            const_spec((1, width)),                    # gamma1
            const_spec((1, width)),                    # beta1
            const_spec((1, width)),                    # gamma2
            const_spec((1, width)),                    # beta2
        ]
        out_spec = pl.BlockSpec((tile, width), lambda i: (i, 0))
        return in_specs, out_spec

    def run(use_pipeline_mode):
        in_specs, out_spec = build_specs(use_pipeline_mode)
        return pl.pallas_call(
            _base_residual_kernel,
            out_shape=jax.ShapeDtypeStruct((tokens, width), x.dtype),
            grid_spec=pltpu.PrefetchScalarGridSpec(
                num_scalar_prefetch=0,
                grid=grid,
                in_specs=in_specs,
                out_specs=out_spec,
            ),
            compiler_params=pltpu.CompilerParams(
                dimension_semantics=("parallel",),
                vmem_limit_bytes=vmem_limit,
            ),
            cost_estimate=cost,
        )(x2d, w1t, w2t, g1, b1, g2, b2)

    try:
        out2d = run(True)
    except Exception:
        # Fallback if this JAX version rejects pipeline_mode / Buffered(1).
        out2d = run(False)

    return out2d.reshape(orig_shape)


def _init_linear_weight(key, width):
    # weight_initializer: fan_avg = 0.5*(in+out) = width; std = sqrt(1/fan_avg/10);
    # trunc_normal in [-2*std, 2*std].
    std = math.sqrt(1.0 / width / 10.0)
    return jax.random.truncated_normal(key, -2.0, 2.0, (width, width), jnp.float32) * std


if __name__ == "__main__":
    batch, seq, width = 2, 8, 32
    key = jax.random.PRNGKey(0)
    kx, k1, k2, k3, k4, k5, k6 = jax.random.split(key, 7)

    x = jax.random.normal(kx, (batch, seq, width), dtype=jnp.float32)
    w1 = _init_linear_weight(k1, width)                        # fc1.weight (out, in)
    w2 = _init_linear_weight(k2, width)                        # fc2.weight (out, in)
    # LayerNorm affine params (PyTorch default is ones/zeros; perturb slightly so the
    # affine path is actually exercised).
    gamma1 = 1.0 + 0.01 * jax.random.normal(k3, (width,), jnp.float32)
    beta1 = 0.01 * jax.random.normal(k4, (width,), jnp.float32)
    gamma2 = 1.0 + 0.01 * jax.random.normal(k5, (width,), jnp.float32)
    beta2 = 0.01 * jax.random.normal(k6, (width,), jnp.float32)

    out = base_residual_layer(x, w1, w2, gamma1, beta1, gamma2, beta2)
    jax.block_until_ready(out)

    # plain-JAX reference of BaseResidualLayer.forward
    def ref(x):
        def ln(v, g, b):
            mean = jnp.mean(v, axis=-1, keepdims=True)
            var = jnp.mean((v - mean) ** 2, axis=-1, keepdims=True)
            return (v - mean) / jnp.sqrt(var + 1e-5) * g + b

        h = ln(x, gamma1, beta1)
        h = jnp.maximum(h, 0.0)
        h = h @ w1.T
        h = ln(h, gamma2, beta2)
        h = jnp.maximum(h, 0.0)
        h = h @ w2.T
        return jnp.maximum(h + x, 0.0)

    assert out.shape == x.shape and out.dtype == x.dtype
    assert jnp.allclose(out, ref(x), atol=5e-5, rtol=5e-5)
    print("KERNEL_OK")
</pallas_src>

<mosaic_0001>
module attributes {stable_mosaic.version = 11 : i64} {
  func.func @_base_residual_kernel(%arg0: i32, %arg1: memref<8x32xf32, #tpu.memory_space<vmem>>, %arg2: memref<32x32xf32, #tpu.memory_space<vmem>>, %arg3: memref<32x32xf32, #tpu.memory_space<vmem>>, %arg4: memref<1x32xf32, #tpu.memory_space<vmem>>, %arg5: memref<1x32xf32, #tpu.memory_space<vmem>>, %arg6: memref<1x32xf32, #tpu.memory_space<vmem>>, %arg7: memref<1x32xf32, #tpu.memory_space<vmem>>, %arg8: memref<8x32xf32, #tpu.memory_space<vmem>>) attributes {dimension_semantics = [#tpu.dimension_semantics<parallel>], iteration_bounds = array<i64: 2>, scalar_prefetch = 0 : i64, scratch_operands = 0 : i64, tpu.core_type = #tpu.core_type<tc>, window_params = [{transform_indices = @transform_0, window_bounds = array<i64: 8, 32>}, {pipeline_mode = #tpu.pipeline_mode<synchronous>, transform_indices = @transform_1, window_bounds = array<i64: 32, 32>}, {pipeline_mode = #tpu.pipeline_mode<synchronous>, transform_indices = @transform_2, window_bounds = array<i64: 32, 32>}, {pipeline_mode = #tpu.pipeline_mode<synchronous>, transform_indices = @transform_3, window_bounds = array<i64: 1, 32>}, {pipeline_mode = #tpu.pipeline_mode<synchronous>, transform_indices = @transform_4, window_bounds = array<i64: 1, 32>}, {pipeline_mode = #tpu.pipeline_mode<synchronous>, transform_indices = @transform_5, window_bounds = array<i64: 1, 32>}, {pipeline_mode = #tpu.pipeline_mode<synchronous>, transform_indices = @transform_6, window_bounds = array<i64: 1, 32>}, {transform_indices = @transform_7, window_bounds = array<i64: 8, 32>}]} {
    %c0 = arith.constant 0 : index
    %c0_0 = arith.constant 0 : index
    %0 = vector.load %arg1[%c0, %c0_0] : memref<8x32xf32, #tpu.memory_space<vmem>>, vector<8x32xf32>
    %c0_1 = arith.constant 0 : index
    %c0_2 = arith.constant 0 : index
    %1 = vector.load %arg4[%c0_1, %c0_2] : memref<1x32xf32, #tpu.memory_space<vmem>>, vector<1x32xf32>
    %c0_3 = arith.constant 0 : index
    %c0_4 = arith.constant 0 : index
    %2 = vector.load %arg5[%c0_3, %c0_4] : memref<1x32xf32, #tpu.memory_space<vmem>>, vector<1x32xf32>
    %c0_5 = arith.constant 0 : index
    %c0_6 = arith.constant 0 : index
    %3 = vector.load %arg6[%c0_5, %c0_6] : memref<1x32xf32, #tpu.memory_space<vmem>>, vector<1x32xf32>
    %c0_7 = arith.constant 0 : index
    %c0_8 = arith.constant 0 : index
    %4 = vector.load %arg7[%c0_7, %c0_8] : memref<1x32xf32, #tpu.memory_space<vmem>>, vector<1x32xf32>
    %cst = arith.constant dense<0.000000e+00> : vector<8xf32>
    %5 = vector.multi_reduction <add>, %0, %cst [1] : vector<8x32xf32> to vector<8xf32>
    %6 = vector.shape_cast %5 : vector<8xf32> to vector<8x1xf32>
    %7 = arith.mulf %0, %0 : vector<8x32xf32>
    %cst_9 = arith.constant dense<0.000000e+00> : vector<8xf32>
    %8 = vector.multi_reduction <add>, %7, %cst_9 [1] : vector<8x32xf32> to vector<8xf32>
    %9 = vector.shape_cast %8 : vector<8xf32> to vector<8x1xf32>
    %cst_10 = arith.constant 3.125000e-02 : f32
    %10 = vector.broadcast %cst_10 : f32 to vector<8x1xf32>
    %11 = arith.mulf %6, %10 : vector<8x1xf32>
    %cst_11 = arith.constant 3.125000e-02 : f32
    %12 = vector.broadcast %cst_11 : f32 to vector<8x1xf32>
    %13 = arith.mulf %9, %12 : vector<8x1xf32>
    %14 = arith.mulf %11, %11 : vector<8x1xf32>
    %15 = arith.subf %13, %14 : vector<8x1xf32>
    %cst_12 = arith.constant 0.000000e+00 : f32
    %16 = vector.broadcast %cst_12 : f32 to vector<8x1xf32>
    %17 = arith.maximumf %15, %16 : vector<8x1xf32>
    %cst_13 = arith.constant 9.99999974E-6 : f32
    %18 = vector.broadcast %cst_13 : f32 to vector<8x1xf32>
    %19 = arith.addf %17, %18 : vector<8x1xf32>
    %20 = math.rsqrt %19 : vector<8x1xf32>
    %21 = vector.broadcast %11 : vector<8x1xf32> to vector<8x32xf32>
    %22 = arith.subf %0, %21 : vector<8x32xf32>
    %23 = vector.broadcast %20 : vector<8x1xf32> to vector<8x32xf32>
    %24 = arith.mulf %22, %23 : vector<8x32xf32>
    %25 = vector.broadcast %1 : vector<1x32xf32> to vector<8x32xf32>
    %26 = arith.mulf %24, %25 : vector<8x32xf32>
    %27 = vector.broadcast %2 : vector<1x32xf32> to vector<8x32xf32>
    %28 = arith.addf %26, %27 : vector<8x32xf32>
    %cst_14 = arith.constant 0.000000e+00 : f32
    %29 = vector.broadcast %cst_14 : f32 to vector<8x32xf32>
    %30 = arith.maximumf %28, %29 : vector<8x32xf32>
    %c0_15 = arith.constant 0 : index
    %c0_16 = arith.constant 0 : index
    %31 = vector.load %arg2[%c0_15, %c0_16] : memref<32x32xf32, #tpu.memory_space<vmem>>, vector<32x32xf32>
    %cst_17 = arith.constant dense<0.000000e+00> : vector<8x32xf32>
    %32 = tpu.matmul %30, %31, %cst_17 {dimension_numbers = #tpu.dot_dimension_numbers<[1], [0], [0], [1], [0, 0, 1, 1], [], []>} : vector<8x32xf32>, vector<32x32xf32>, vector<8x32xf32> -> vector<8x32xf32>
    %cst_18 = arith.constant dense<0.000000e+00> : vector<8xf32>
    %33 = vector.multi_reduction <add>, %32, %cst_18 [1] : vector<8x32xf32> to vector<8xf32>
    %34 = vector.shape_cast %33 : vector<8xf32> to vector<8x1xf32>
    %35 = arith.mulf %32, %32 : vector<8x32xf32>
    %cst_19 = arith.constant dense<0.000000e+00> : vector<8xf32>
    %36 = vector.multi_reduction <add>, %35, %cst_19 [1] : vector<8x32xf32> to vector<8xf32>
    %37 = vector.shape_cast %36 : vector<8xf32> to vector<8x1xf32>
    %cst_20 = arith.constant 3.125000e-02 : f32
    %38 = vector.broadcast %cst_20 : f32 to vector<8x1xf32>
    %39 = arith.mulf %34, %38 : vector<8x1xf32>
    %cst_21 = arith.constant 3.125000e-02 : f32
    %40 = vector.broadcast %cst_21 : f32 to vector<8x1xf32>
    %41 = arith.mulf %37, %40 : vector<8x1xf32>
    %42 = arith.mulf %39, %39 : vector<8x1xf32>
    %43 = arith.subf %41, %42 : vector<8x1xf32>
    %cst_22 = arith.constant 0.000000e+00 : f32
    %44 = vector.broadcast %cst_22 : f32 to vector<8x1xf32>
    %45 = arith.maximumf %43, %44 : vector<8x1xf32>
    %cst_23 = arith.constant 9.99999974E-6 : f32
    %46 = vector.broadcast %cst_23 : f32 to vector<8x1xf32>
    %47 = arith.addf %45, %46 : vector<8x1xf32>
    %48 = math.rsqrt %47 : vector<8x1xf32>
    %49 = vector.broadcast %39 : vector<8x1xf32> to vector<8x32xf32>
    %50 = arith.subf %32, %49 : vector<8x32xf32>
    %51 = vector.broadcast %48 : vector<8x1xf32> to vector<8x32xf32>
    %52 = arith.mulf %50, %51 : vector<8x32xf32>
    %53 = vector.broadcast %3 : vector<1x32xf32> to vector<8x32xf32>
    %54 = arith.mulf %52, %53 : vector<8x32xf32>
    %55 = vector.broadcast %4 : vector<1x32xf32> to vector<8x32xf32>
    %56 = arith.addf %54, %55 : vector<8x32xf32>
    %cst_24 = arith.constant 0.000000e+00 : f32
    %57 = vector.broadcast %cst_24 : f32 to vector<8x32xf32>
    %58 = arith.maximumf %56, %57 : vector<8x32xf32>
    %c0_25 = arith.constant 0 : index
    %c0_26 = arith.constant 0 : index
    %59 = vector.load %arg3[%c0_25, %c0_26] : memref<32x32xf32, #tpu.memory_space<vmem>>, vector<32x32xf32>
    %cst_27 = arith.constant dense<0.000000e+00> : vector<8x32xf32>
    %60 = tpu.matmul %58, %59, %cst_27 {dimension_numbers = #tpu.dot_dimension_numbers<[1], [0], [0], [1], [0, 0, 1, 1], [], []>} : vector<8x32xf32>, vector<32x32xf32>, vector<8x32xf32> -> vector<8x32xf32>
    %c0_28 = arith.constant 0 : index
    %c0_29 = arith.constant 0 : index
    %61 = vector.load %arg1[%c0_28, %c0_29] : memref<8x32xf32, #tpu.memory_space<vmem>>, vector<8x32xf32>
    %62 = arith.addf %60, %61 : vector<8x32xf32>
    %cst_30 = arith.constant 0.000000e+00 : f32
    %63 = vector.broadcast %cst_30 : f32 to vector<8x32xf32>
    %64 = arith.maximumf %62, %63 : vector<8x32xf32>
    %c0_31 = arith.constant 0 : index
    %c0_32 = arith.constant 0 : index
    %65 = vector.load %arg8[%c0_31, %c0_32] : memref<8x32xf32, #tpu.memory_space<vmem>>, vector<8x32xf32>
    tpu.vector_store %arg8[%c0_31, %c0_32], %64 {strides = array<i32>} : memref<8x32xf32, #tpu.memory_space<vmem>>, vector<8x32xf32>,
    return
  }
  func.func @transform_0(%arg0: i32) -> (i32, i32) {
    %c0_i32 = arith.constant 0 : i32
    %c0_i32_0 = arith.constant 0 : i32
    return %arg0, %c0_i32 : i32, i32
  }
  func.func @transform_1(%arg0: i32) -> (i32, i32) {
    %c0_i32 = arith.constant 0 : i32
    %c0_i32_0 = arith.constant 0 : i32
    %c0_i32_1 = arith.constant 0 : i32
    return %c0_i32, %c0_i32_0 : i32, i32
  }
  func.func @transform_2(%arg0: i32) -> (i32, i32) {
    %c0_i32 = arith.constant 0 : i32
    %c0_i32_0 = arith.constant 0 : i32
    %c0_i32_1 = arith.constant 0 : i32
    return %c0_i32, %c0_i32_0 : i32, i32
  }
  func.func @transform_3(%arg0: i32) -> (i32, i32) {
    %c0_i32 = arith.constant 0 : i32
    %c0_i32_0 = arith.constant 0 : i32
    %c0_i32_1 = arith.constant 0 : i32
    return %c0_i32, %c0_i32_0 : i32, i32
  }
  func.func @transform_4(%arg0: i32) -> (i32, i32) {
    %c0_i32 = arith.constant 0 : i32
    %c0_i32_0 = arith.constant 0 : i32
    %c0_i32_1 = arith.constant 0 : i32
    return %c0_i32, %c0_i32_0 : i32, i32
  }
  func.func @transform_5(%arg0: i32) -> (i32, i32) {
    %c0_i32 = arith.constant 0 : i32
    %c0_i32_0 = arith.constant 0 : i32
    %c0_i32_1 = arith.constant 0 : i32
    return %c0_i32, %c0_i32_0 : i32, i32
  }
  func.func @transform_6(%arg0: i32) -> (i32, i32) {
    %c0_i32 = arith.constant 0 : i32
    %c0_i32_0 = arith.constant 0 : i32
    %c0_i32_1 = arith.constant 0 : i32
    return %c0_i32, %c0_i32_0 : i32, i32
  }
  func.func @transform_7(%arg0: i32) -> (i32, i32) {
    %c0_i32 = arith.constant 0 : i32
    %c0_i32_0 = arith.constant 0 : i32
    return %arg0, %c0_i32 : i32, i32
  }
}

</mosaic_0001>

<bundles_post_ra>
// kernel: tpu_custom_call.1
= control target key start
LH: loop header
LB: loop body
LE: loop exit
PB: predicated region body
PF: predicated region fallthrough
CT: control target
= control target key end

     0   :  { %12 = vsyncpa [#allocation3], 0  ;;  %s1258_s0 = inlined_call_operand.hbm [shape: f32[16,32], index: 0, kind: input, shape index: {}]   ;;  %s1259_s1 = inlined_call_operand.hbm [shape: f32[32,32], index: 1, kind: input, shape index: {}]   ;;  %s1260_s2 = inlined_call_operand.hbm [shape: f32[32,32], index: 2, kind: input, shape index: {}]   ;;  %s1261_s3 = inlined_call_operand.vmem [shape: f32[1,32], index: 3, kind: input, shape index: {}]   ;;  %s1262_s4 = inlined_call_operand.vmem [shape: f32[1,32], index: 4, kind: input, shape index: {}]   ;;  %s1263_s5 = inlined_call_operand.vmem [shape: f32[1,32], index: 5, kind: input, shape index: {}]   ;;  %s1264_s6 = inlined_call_operand.vmem [shape: f32[1,32], index: 6, kind: input, shape index: {}]   ;;  %s1265_s7 = inlined_call_operand.hbm [shape: f32[16,32], index: 7, kind: output, shape index: {}]  }
   0x1   :  { %14 = vsyncpa [#allocation3 + $0x1], 0 }
   0x2   :  { %15 = vsyncpa [#allocation6], 0 }
   0x3   :  { %16 = vsyncpa [#allocation4], 0 }
   0x4   :  { %18 = vsyncpa [#allocation4 + $0x1], 0  ;;  %s999_s24 = smov 0   ;;  %s1001_s25 = smov 0  }
   0x5   :  { %s1003_s26 = smov 0   ;;  %s1005_s27 = smov 0  }
   0x6 LB: > { %s1020_s28 = sadd.s32 4294967295, %s948_s27   ;;  %s650_s29 = sadd.s32 4294967294, %s948_s27   ;;  %s948_s27 = sphi %s1005_s27, %s1285_s27   ;;  %s944_s26 = sphi %s1003_s26, %s1284_s26   ;;  %s940_s25 = sphi %s1001_s25, %s1283_s25   ;;  %s936_s24 = sphi %s999_s24, %s1282_s24  }
   0x7   : > { %p44_p0 = scmp.ne.s32.totalorder %s940_s25, %s936_s24  ;;  %p1266_p1 = scmp.eq.s32.totalorder %s1020_s28, 0 }
   0x8   : > { %p200_p3 = scmp.eq.s32.totalorder %s650_s29, 1  ;;  %p651_p5 = scmp.ge.s32.totalorder %s948_s27, 1 }
   0x9   : > { %p1029_p4 = por %p1266_p1, %p44_p0  ;;  %p207_p7 = scmp.lt.s32.totalorder %s948_s27, 3 }
   0xa   : > { %p1034_p6 = por %p200_p3, %p44_p0  ;;  %s950_s10 = smov [#allocation5]  }
   0xb   : > { %s1269_s30 = scalar_select %p1029_p4, 1, 0 }
   0xc   : > { %s1270_s8 = scalar_select %p1034_p6, 1, 0 }
   0xd   : > { %p1039_p8 = pnand %p651_p5, %p207_p7  ;;  %s219_s11 = sshll.u32 %s950_s10, 4  ;;  %s1043_s11 = int_to_ptr.vmem [resolvable:$true] %s219_s11 }
   0xe   : > { %s951_s13 = smov [#allocation7]   ;;  %s792_s17 = scalar_lea.hbm %s1259_s1, 512 }
   0xf   : > { %p728_p9 = pneg %p1039_p8  ;;  %s232_s14 = sshll.u32 %s951_s13, 4  ;;  %s1054_s14 = int_to_ptr.vmem [resolvable:$true] %s232_s14 }
  0x10   : > { %p793_p12 = scmp.ne.s32.totalorder %s1259_s1, %s792_s17  ;;  %p799_p5 = scmp.lt.u32.totalorder %s792_s17, %s1259_s1 }
  0x11   : > { %p1050_p11 = pnand %p728_p9, %p1266_p1 }
  0x13   : > { %p794_p13 = pneg %p1050_p11 }
  0x15   : > { %p795_p0 = pnand %p794_p13, %p793_p12 }
  0x17   : > { %p796_p3 = pneg %p795_p0 }
  0x19   : > { %p801_p7 = pnand %p799_p5, %p796_p3 }
  0x1b   : > { %804 = shalt.err (!%p801_p7)
}
  0x1c   : > { %s805_s22 = scalar_lea.vmem %s1043_s11, 512  ;;  %p813_p2 = scmp.lt.s32.totalorder %s1043_s11, %s1043_s11 }
  0x1d   : > { %p806_p9 = scmp.ne.s32.totalorder %s1043_s11, %s805_s22  ;;  %p814_p12 = scmp.lt.s32.totalorder %s805_s22, %s805_s22 }
  0x1f   : > { %p808_p10 = pnand %p806_p9, %p794_p13  ;;  %p815_p0 = por %p814_p12, %p813_p2 }
  0x21   : > { %p809_p1 = pneg %p808_p10 }
  0x23   : > { %p816_p6 = pnand %p815_p0, %p809_p1 }
  0x25   : > { %819 = shalt.err (!%p816_p6)
}
  0x26   : > { %s952_s23 = smov 128   ;;  %s953_s29 = smov 8  }
  0x27   : > { %731 = dma.hbm_to_vmem [thread:$0]  (!%p1050_p11), %s1259_s1, 512, %s1043_s11, [#allocation6], %s952_s23, %s952_s23, %s953_s29  }
  0x28   : > { %s820_s17 = scalar_lea.hbm %s1260_s2, 512 }
  0x29   : > { %p821_p2 = scmp.ne.s32.totalorder %s1260_s2, %s820_s17  ;;  %p827_p10 = scmp.lt.u32.totalorder %s820_s17, %s1260_s2 }
  0x2b   : > { %p823_p1 = pnand %p821_p2, %p794_p13 }
  0x2d   : > { %p824_p6 = pneg %p823_p1 }
  0x2f   : > { %p829_p3 = pnand %p827_p10, %p824_p6 }
  0x31   : > { %832 = shalt.err (!%p829_p3)
}
  0x32   : > { %s833_s11 = scalar_lea.vmem %s1054_s14, 512  ;;  %p841_p12 = scmp.lt.s32.totalorder %s1054_s14, %s1054_s14 }
  0x33   : > { %p834_p5 = scmp.ne.s32.totalorder %s1054_s14, %s833_s11  ;;  %p842_p0 = scmp.lt.s32.totalorder %s833_s11, %s833_s11 }
  0x35   : > { %p836_p7 = pnand %p834_p5, %p794_p13  ;;  %p843_p2 = por %p842_p0, %p841_p12 }
  0x37   : > { %p837_p9 = pneg %p836_p7 }
  0x39   : > { %p844_p1 = pnand %p843_p2, %p837_p9 }
  0x3b   : > { %847 = shalt.err (!%p844_p1)
}
  0x3c   : > { %734 = dma.hbm_to_vmem [thread:$0]  (!%p1050_p11), %s1260_s2, 512, %s1054_s14, [#allocation6], %s952_s23, %s952_s23, %s953_s29  }
  0x3d   : > { %s1109_s13 = sadd.s32 1, %s948_s27   ;;  %s31_s12 = sadd.s32 1, %s944_s26 }
  0x3e   : > { %s28_s15 = ssub.s32 %s948_s27, %s1109_s13  ;;  %p38_p13 = scmp.ne.s32.totalorder %s944_s26, %s940_s25 }
  0x3f   : > { %p29_p6 = scmp.eq.s32.totalorder %s28_s15, 0  ;;  %p39_p10 = scmp.eq.s32.totalorder %s948_s27, 0 }
  0x40   : > { %p1273_p3 = scmp.eq.s32.totalorder %s1020_s28, 1  ;;  %p745_p7 = scmp.lt.s32.totalorder %s948_s27, 2 }
  0x41   : > { %s1125_s17 = scalar_select %p29_p6, %s944_s26, %s31_s12  }
  0x42   : > { %p1119_p5 = por %p1273_p3, %p38_p13  ;;  %p40_p9 = por %p39_p10, %p38_p13 }
  0x43   : > { %s258_s18 = sand.u32 1, %s944_s26   ;;  %s656_s14 = sshll.u32 %s948_s27, 7 }
  0x44   : > { %s1274_s16 = scalar_select %p1119_p5, 1, 0 }
  0x45   : > { %s655_s19 = sshll.u32 %s258_s18, 3  ;;  %s1132_s20 = scalar_lea.hbm %s1258_s0, %s656_s14 }
  0x46   : > { %s262_s21 = scalar_lea.vmem [#allocation2], %s655_s19  ;;  %p1136_p11 = pnand %p745_p7, %p40_p9 }
  0x47   : > { %s269_s11 = sshll.u32 %s262_s21, 4  ;;  %s259_s10 = scalar_lea.sflag [#allocation3], %s258_s18  ;;  %s1134_s11 = int_to_ptr.vmem [resolvable:$true] %s269_s11 }
  0x48   : > { %s848_s12 = scalar_lea.hbm %s1132_s20, 128  ;;  %p850_p0 = pneg %p1136_p11 }
  0x49   : > { %p849_p12 = scmp.ne.s32.totalorder %s1132_s20, %s848_s12  ;;  %s853_s14 = scalar_lea.hbm %s1258_s0, 256 }
  0x4a   : > { %p854_p13 = scmp.lt.u32.totalorder %s1132_s20, %s1258_s0  ;;  %p855_p6 = scmp.lt.u32.totalorder %s853_s14, %s848_s12 }
  0x4b   : > { %p851_p2 = pnand %p850_p0, %p849_p12  ;;  %p857_p3 = scmp.lt.u32.totalorder %s848_s12, %s1132_s20 }
  0x4c   : > { %p856_p10 = por %p855_p6, %p854_p13 }
  0x4d   : > { %p852_p1 = pneg %p851_p2 }
  0x4e   : > { %p858_p7 = por %p857_p3, %p856_p10 }
  0x50   : > { %p859_p9 = pnand %p858_p7, %p852_p1 }
  0x52   : > { %862 = shalt.err (!%p859_p9)
}
  0x53   : > { %s863_s18 = scalar_lea.vmem %s1134_s11, 128  ;;  %s954_s21 = smov [#allocation2]  }
  0x54   : > { %p864_p12 = scmp.ne.s32.totalorder %s1134_s11, %s863_s18  ;;  %s868_s15 = sshll.u32 %s954_s21, 4  ;;  %s869_s15 = int_to_ptr.vmem [resolvable:$false] %s868_s15 }
  0x55   : > { %s870_s19 = scalar_lea.vmem %s869_s15, 256  ;;  %p871_p4 = scmp.lt.s32.totalorder %s1134_s11, %s869_s15 }
  0x56   : > { %p866_p2 = pnand %p864_p12, %p850_p0  ;;  %p872_p13 = scmp.lt.s32.totalorder %s870_s19, %s863_s18 }
  0x58   : > { %p867_p5 = pneg %p866_p2  ;;  %p873_p6 = por %p872_p13, %p871_p4 }
  0x5a   : > { %p874_p10 = pnand %p873_p6, %p867_p5 }
  0x5c   : > { %877 = shalt.err (!%p874_p10)
}
  0x5d   : > { %738 = dma.hbm_to_vmem [thread:$0]  (!%p1136_p11), %s1132_s20, 128, %s1134_s11, %s259_s10  }
  0x5e   : > { %278 = sbr.rel (%p1039_p8) target bundleno = 896 (0x380), region = 48  ;;  %s1168_s12 = sand.u32 (!%p1039_p8), 1, %s940_s25  }
  0x5f   : > { %s658_s14 = sshll.u32 (!%p1039_p8), %s1168_s12, 3  ;;  %s281_s23 = scalar_lea.sflag (!%p1039_p8), [#allocation3], %s1168_s12 }
  0x60   : > { %s284_s29 = scalar_lea.vmem (!%p1039_p8), [#allocation2], %s658_s14  ;;  %p1276_p4 = scmp.ne.s32.totalorder (!%p1039_p8), %s1269_s30, 0 }
  0x65   : > { %923 = dma.done.wait (%p1276_p4), %s281_s23, 128  }
  0x66   : > { %925 = vsyncadd (%p1276_p4), %s281_s23, 4294967168  ;;  %p1277_p5 = scmp.eq.s32.totalorder %s1020_s28, 0 }
  0x68   : > { %927 = dma.done.wait (%p1277_p5), [#allocation6], 1024   ;;  %p1278_p8 = pmov %p1277_p5 }
  0x69   : > { %vm328_vm0 = vcmask 261120   ;;  %v1182_v0 = vld [vmem:[%s284_s29] sm:$0xff]  ;;  %v360_v4 = vld [vmem:[#allocation5] sm:$0xff]  ;;  %v361_v5 = vld [vmem:[#allocation5 + $0x8] sm:$0xff]  ;;  %v955_v7 = vmov 0.0|0.0   ;;  %vm956_vm1 = vmmov 0  }
  0x6a   : > { %929 = vsyncadd (%p1278_p8), [#allocation6], 4294966272  ;;  %v329_v1 = vsel %vm328_vm0, %v1182_v0, 0.0  ;;  %v332_v2 = vmul.f32 %v1182_v0, %v1182_v0  ;;  %v362_v6 = vld [vmem:[#allocation5 + $0x10] sm:$0xff]  ;;  %704 = vmatprep.subr.bf16.mxu0 %v955_v7  ;;  %v705_v8 = vpack.c.bf16 %v361_v5, %v360_v4  ;;  %v363_v9 = vld [vmem:[#allocation5 + $0x18] sm:$0xff]  ;;  %v957_v10 = vmov 0.0   ;;  %710 = vmatprep.subr.bf16.mxu1 %v955_v7 }
  0x6b   : > { %330 = vadd.xlane.f32.xlu0 %v329_v1  ;;  %690 = vmatprep.mubr.msk.f32.mxu0 %vm956_vm1, %v957_v10  ;;  %v708_v11 = vpack.c.bf16 %v363_v9, %v362_v6  ;;  %v662_v22 = vld [vmem:[%s1261_s3] ss:$0 sm:$0xff]  ;;  %v468_v33 = vld [vmem:[#allocation7] sm:$0xff]  ;;  %v469_v34 = vld [vmem:[#allocation7 + $0x8] sm:$0xff]  ;;  %s669_s15 = sshll.u32 %s1020_s28, 7  ;;  %s322_s19 = scalar_lea.vmem [#allocation8], %s658_s14 }
  0x6c   : > { %v333_v3 = vsel %vm328_vm0, %v332_v2, 0.0  ;;  %701 = vmatprep.mubr.msk.f32.mxu1 %vm956_vm1, %v957_v10  ;;  %706 = vmatpush3.bf16.msra.mxu0 %v705_v8  ;;  %v663_v24 = vld [vmem:[%s1262_s4] ss:$0 sm:$0xff]  ;;  %v711_v36 = vpack.c.bf16 %v469_v34, %v468_v33  ;;  %v471_v37 = vld [vmem:[#allocation7 + $0x18] sm:$0xff]  ;;  %s561_s23 = sshll.u32 %s322_s19, 4  ;;  %s1213_s9 = scalar_lea.hbm %s1265_s7, %s669_s15  ;;  %s1215_s23 = int_to_ptr.vmem [resolvable:$true] %s561_s23 }
  0x6d   : > { %707 = vmatprep.subr.bf16.mxu0 %v955_v7  ;;  %v470_v35 = vld [vmem:[#allocation7 + $0x10] sm:$0xff]  ;;  %s548_s28 = scalar_lea.sflag [#allocation4], %s1168_s12  ;;  %s878_s20 = scalar_lea.vmem %s1215_s23, 128 }
  0x6e   : > { %712 = vmatpush3.bf16.msra.mxu1 %v711_v36  ;;  %v714_v38 = vpack.c.bf16 %v471_v37, %v470_v35  ;;  %v665_v49 = vld [vmem:[%s1263_s5] ss:$0 sm:$0xff]  ;;  %p879_p11 = scmp.ne.s32.totalorder %s1215_s23, %s878_s20  ;;  %p1279_p0 = scmp.ne.s32.totalorder %s1274_s16, 0 }
  0x6f   : > { %334 = vadd.xlane.f32.xlu0 %v333_v3  ;;  %713 = vmatprep.subr.bf16.mxu1 %v955_v7  ;;  %v666_v51 = vld [vmem:[%s1264_s6] ss:$0 sm:$0xff]  ;;  %s958_s14 = smov [#allocation8]  }
  0x70   : > { %709 = vmatpush3.bf16.msra.mxu0 %v708_v11  ;;  %p880_p1 = pnand %p879_p11, %p1279_p0  ;;  %s882_s11 = sshll.u32 %s958_s14, 4  ;;  %s883_s11 = int_to_ptr.vmem [resolvable:$false] %s882_s11 }
  0x71   : > { %s884_s22 = scalar_lea.vmem %s883_s11, 256  ;;  %p885_p7 = scmp.lt.s32.totalorder %s1215_s23, %s883_s11 }
  0x72   : > { %715 = vmatpush3.bf16.msra.mxu1 %v714_v38  ;;  %p881_p3 = pneg %p880_p1  ;;  %p886_p9 = scmp.lt.s32.totalorder %s884_s22, %s878_s20 }
  0x74   : > { %p887_p12 = por %p886_p9, %p885_p7 }
  0x76   : > { %p888_p2 = pnand %p887_p12, %p881_p3 }
  0xf8   : > { %v331_v12 = vpop.xlane.xlu0 %330 }
  0xf9   : > { %v336_v13 = vmul.f32 0.03125, %v331_v12 }
  0xfb   : > { %v338_v15 = vmul.f32 %v336_v13, %v336_v13  ;;  %v343_v20 = vsub.f32 %v1182_v0, %v336_v13 }
  0xfc   : > { %v335_v14 = vpop.xlane.xlu0 %334 }
  0xfd   : > { %v337_v16 = vmul.f32 0.03125, %v335_v14 }
  0xff   : > { %v339_v17 = vsub.f32 %v337_v16, %v338_v15 }
 0x101   : > { %v340_v18 = vmax.f32 %v339_v17, 0.0 }
 0x103   : > { %v341_v19 = vadd.f32 1e-05, %v340_v18 }
 0x105   : > { %788 = vrsqrt.f32 %v341_v19 }
 0x10f   : > { %v789_v21 = vpop.eup %788 }
 0x110   : > { %v344_v23 = vmul.f32 %v789_v21, %v343_v20 }
 0x112   : > { %v351_v25 = vmul.f32 %v662_v22, %v344_v23 }
 0x114   : > { %v358_v26 = vadd.f32 %v663_v24, %v351_v25 }
 0x116   : > { %v359_v27 = vmax.f32 %v358_v26, 0.0 }
 0x118   : > { %691 = vmatmul.mubr.msk.f32.vlgmr.msra.gmra.mrb[0].mxu0 %vm328_vm0, %v359_v27 }
 0x1eb   : > { %v433_v28 = vpop.f32.mrb[0].mxu0 }
 0x1ec   : > { %v692_v29 = vpop.f32.mrb[1].mxu0  ;;  %v437_v30 = vsel %vm328_vm0, %v433_v28, 0.0  ;;  %v440_v31 = vmul.f32 %v433_v28, %v433_v28 }
 0x1ed   : > { %438 = vadd.xlane.f32.xlu1 %v437_v30 }
 0x1ee   : > { %v441_v32 = vsel %vm328_vm0, %v440_v31, 0.0 }
 0x1f1   : > { %442 = vadd.xlane.f32.xlu1 %v441_v32 }
 0x27a   : > { %v439_v39 = vpop.xlane.xlu1 %438 }
 0x27b   : > { %v444_v40 = vmul.f32 0.03125, %v439_v39 }
 0x27d   : > { %v446_v42 = vmul.f32 %v444_v40, %v444_v40  ;;  %v451_v47 = vsub.f32 %v433_v28, %v444_v40 }
 0x27e   : > { %v443_v41 = vpop.xlane.xlu1 %442 }
 0x27f   : > { %v445_v43 = vmul.f32 0.03125, %v443_v41 }
 0x281   : > { %v447_v44 = vsub.f32 %v445_v43, %v446_v42 }
 0x283   : > { %v448_v45 = vmax.f32 %v447_v44, 0.0 }
 0x285   : > { %v449_v46 = vadd.f32 1e-05, %v448_v45 }
 0x287   : > { %790 = vrsqrt.f32 %v449_v46 }
 0x291   : > { %v791_v48 = vpop.eup %790 }
 0x292   : > { %v452_v50 = vmul.f32 %v791_v48, %v451_v47 }
 0x294   : > { %v459_v52 = vmul.f32 %v665_v49, %v452_v50 }
 0x296   : > { %v466_v53 = vadd.f32 %v666_v51, %v459_v52 }
 0x298   : > { %v467_v54 = vmax.f32 %v466_v53, 0.0 }
 0x29a   : > { %702 = vmatmul.mubr.msk.f32.vlgmr.msra.gmra.mrb[0].mxu1 %vm328_vm0, %v467_v54 }
 0x36d   : > { %v541_v55 = vpop.f32.mrb[0].mxu1 }
 0x36e   : > { %v542_v56 = vadd.f32 %v541_v55, %v1182_v0  ;;  %v703_v57 = vpop.f32.mrb[1].mxu1 }
 0x370   : > { %v545_v58 = vmax.f32 %v542_v56, 0.0 }
 0x372   : > { %546 = vst.msk [vmem:[%s322_s19] sm:$0xff] %vm328_vm0, %v545_v58 }
 0x373   : > { %891 = shalt.err (!%p888_p2)
}
 0x374   : > { %s892_s12 = scalar_lea.hbm %s1213_s9, 128  ;;  %s896_s21 = scalar_lea.hbm %s1265_s7, 256 }
 0x375   : > { %p893_p13 = scmp.ne.s32.totalorder %s1213_s9, %s892_s12  ;;  %p897_p4 = scmp.lt.u32.totalorder %s1213_s9, %s1265_s7 }
 0x376   : > { %p898_p5 = scmp.lt.u32.totalorder %s896_s21, %s892_s12  ;;  %p900_p11 = scmp.lt.u32.totalorder %s892_s12, %s1213_s9 }
 0x377   : > { %p894_p6 = pnand %p893_p13, %p1279_p0 }
 0x378   : > { %p899_p8 = por %p898_p5, %p897_p4 }
 0x379   : > { %p895_p10 = pneg %p894_p6 }
 0x37a   : > { %p901_p1 = por %p900_p11, %p899_p8 }
 0x37c   : > { %p902_p3 = pnand %p901_p1, %p895_p10 }
 0x37e   : > { %905 = shalt.err (!%p902_p3)
}
 0x37f   : > { %726 = dma.vmem_to_hbm [thread:$0]  (%p1279_p0), %s1215_s23, 128, %s1213_s9, %s548_s28  }
 0x380 PF: > { %s573_s29 = sand.u32 1, %s936_s24   ;;  %p1280_p7 = scmp.ne.s32.totalorder %s1270_s8, 0 }
 0x381   : > { %p1281_p9 = scmp.ge.s32.totalorder %s948_s27, 2  ;;  %s574_s30 = scalar_lea.sflag [#allocation4], %s573_s29 }
 0x383   : > { %p740_p12 = pnand %p1281_p9, %p1280_p7 }
 0x385   : > { %931 = dma.done.wait (!%p740_p12), %s574_s30, 128  }
 0x386   : > { %933 = vsyncadd (!%p740_p12), %s574_s30, 4294967168  ;;  %p21_p2 = scmp.ge.s32.totalorder %s1109_s13, 4   ;;  %s1282_s24 = smov %s940_s25 }
 0x387   : > { %s1283_s25 = smov %s944_s26  ;;  %s1284_s26 = smov %s1125_s17 }
 0x388   : > { %s1285_s27 = smov %s1109_s13  ;;  %23 = sbr.rel (!%p21_p2) target bundleno = 6 (0x6), region = 101 }
 0x38f   :  { %579 = vsyncpa [#allocation3], 1 }
 0x390   :  { %581 = vsyncpa [#allocation3 + $0x1], 1 }
 0x391   :  { %582 = vsyncpa [#allocation6], 1 }
 0x392   :  { %583 = vsyncpa [#allocation4], 1 }
 0x393   :  { %585 = vsyncpa [#allocation4 + $0x1], 1 }

</bundles_post_ra>
